<compile_context>
chip_gen: v5e
topology: v5e:2x2
jax: 0.10.0
libtpu: 0.0.40
codegen_flags: <defaults>
</compile_context>

<pallas_src>
import functools
import math
import numpy as np

import jax
import jax.numpy as jnp
from jax.experimental import pallas as pl
from jax.experimental.pallas import tpu as pltpu


def _round_up(x, m):
    return (x + m - 1) // m * m


def _cdiv(a, b):
    return -(-a // b)


def _vmem_budget():
    """Generation-aware (input-block budget, scoped-VMEM limit) in bytes."""
    try:
        cap = int(pltpu.get_tpu_info().vmem_capacity_bytes)
    except Exception:
        cap = 64 * 1024 * 1024
    if cap >= 96 * 1024 * 1024:                # v5e / v6e (128 MiB physical)
        return 24 * 1024 * 1024, 96 * 1024 * 1024
    return 12 * 1024 * 1024, 32 * 1024 * 1024  # v7x (64 MiB physical) / fallback


def _batch_tile(batch, cap):
    """Largest batch tile <= cap that divides `batch` and keeps the (tB, 1)
    output block legal (tB == B or tB % 8 == 0)."""
    cap = min(batch, max(1, cap))
    if cap >= batch:
        return batch
    for d in range(cap, 0, -1):
        if batch % d == 0 and d % 8 == 0:
            return d
    return batch  # no legal smaller tile -> keep full batch, shrink time instead


# ----------------------------------------------------------------------------
# Per-language confidence kernel (native (B, T, V) layout, vocab on lanes)
# ----------------------------------------------------------------------------
def _confidence_kernel(x_ref, out_ref, ssum_ref, len_ref, *,
                       vocab_id, log_vocab, t_valid, t_tile):
    """One (batch-tile, time-tile) grid step for a single language.

    x_ref    : VMEM (tB, tT, V) logits in native layout (vocab on lanes)
    out_ref  : VMEM (tB, 1) f32 confidence, written once per batch tile
    ssum_ref, len_ref : VMEM (tB, 1) f32 running sums across time tiles
    """
    t = pl.program_id(1)
    nt = pl.num_programs(1)

    @pl.when(t == 0)
    def _():
        ssum_ref[...] = jnp.zeros_like(ssum_ref)
        len_ref[...] = jnp.zeros_like(len_ref)

    x = x_ref[...]                                   # (tB, tT, V), native dtype
    _, tt, V = x.shape

    # max(log_softmax(x)) = -log(sum(exp(x - max(x)))); argmax(log_softmax)=argmax(x)
    m = jnp.max(x, axis=-1, keepdims=True)                                 # (tB,tT,1)
    sumexp = jnp.sum(jnp.exp((x - m).astype(jnp.float32)),
                     axis=-1, keepdims=True)                               # (tB,tT,1) f32
    max_logprob = -jnp.log(sumexp)                                         # (tB,tT,1) f32

    # First-occurrence argmax over the vocab (lane) axis without an argsort:
    # argmax = min(i : x[i] == max).  Exact-equality compare stays in the
    # input dtype (no arithmetic before the compare -> ties behave like argmax).
    v_iota = jax.lax.broadcasted_iota(jnp.int32, (1, 1, V), 2).astype(jnp.float32)
    argmax = jnp.min(jnp.where(x == m, v_iota, float(V)),
                     axis=-1, keepdims=True)                               # (tB,tT,1)
    keep = argmax != float(vocab_id)                                       # (tB,tT,1)

    if t_valid is not None:  # static: only emitted when the last time tile is partial
        t_iota = jax.lax.broadcasted_iota(jnp.int32, (1, tt, 1), 1)
        keep = keep & ((t * t_tile + t_iota) < t_valid)

    len_ref[...] += jnp.sum(keep.astype(jnp.float32), axis=1)              # (tB,1)
    ssum_ref[...] += jnp.sum(jnp.where(keep, max_logprob, 0.0), axis=1)    # (tB,1)

    @pl.when(t == nt - 1)
    def _():
        out_ref[...] = ssum_ref[...] / (len_ref[...] * log_vocab + 1e-5)


def _lang_confidence(x, vocab_id, *, block_budget, vmem_limit):
    """Per-language confidence column: (B, T, V) logits -> (B, 1) f32."""
    B, T, V = x.shape
    itemsize = int(jnp.dtype(x.dtype).itemsize)
    v_lanes = _round_up(V, 128)  # in-VMEM lane padding (HBM traffic stays exact)

    def blk_bytes(tb, tt):
        # double-buffered input block, (8, 128)-tiled in VMEM
        return 2 * tb * _round_up(tt, 8) * v_lanes * itemsize

    # Prefer the full, unpadded T as the trailing block extent (legal: a block
    # dim may equal the full array dim); shrink batch, then time, to fit.
    tB, tT = B, T
    if blk_bytes(tB, tT) > block_budget:
        cap = block_budget // max(1, blk_bytes(1, T))
        tB = _batch_tile(B, cap)
    if blk_bytes(tB, tT) > block_budget:
        per_row = 2 * tB * v_lanes * itemsize
        tT = max(8, (block_budget // max(1, per_row)) // 8 * 8)
        tT = min(tT, T)
    # v7x megacore: ensure >= 2 parallel batch blocks when the batch is large.
    if B // tB == 1 and B >= 16 and (B // 2) % 8 == 0:
        tB = B // 2

    nB = B // tB
    nT = _cdiv(T, tT)
    t_valid = T if nT * tT != T else None

    kernel = functools.partial(
        _confidence_kernel,
        vocab_id=int(vocab_id),
        log_vocab=float(math.log(vocab_id)),   # host-side, matches np.log in torch ref
        t_valid=t_valid,
        t_tile=tT)

    n_elem = B * T * V
    # NOTE: if a profile on v5e shows exposed DMA for long sequences, the input
    # BlockSpec can take pipeline_mode=pl.Buffered(3) (ample VMEM headroom there).
    return pl.pallas_call(
        kernel,
        out_shape=jax.ShapeDtypeStruct((B, 1), jnp.float32),
        grid_spec=pltpu.PrefetchScalarGridSpec(
            num_scalar_prefetch=0,
            grid=(nB, nT),
            in_specs=[pl.BlockSpec((tB, tT, V), lambda b, t: (b, t, 0))],
            out_specs=pl.BlockSpec((tB, 1), lambda b, t: (b, 0)),
            scratch_shapes=[pltpu.VMEM((tB, 1), jnp.float32),
                            pltpu.VMEM((tB, 1), jnp.float32)],
        ),
        compiler_params=pltpu.CompilerParams(
            dimension_semantics=("parallel", "arbitrary"),
            vmem_limit_bytes=vmem_limit),
        cost_estimate=pl.CostEstimate(
            flops=int(8 * n_elem),
            transcendentals=int(n_elem),
            bytes_accessed=int(n_elem * itemsize + B * 4)),
    )(x)


# ----------------------------------------------------------------------------
# Full forward
# ----------------------------------------------------------------------------
def lang_confidences(x_dict, lang2vocab, lang2index, *, block_budget_bytes=None):
    """res_tensor of shape (B, classes); missing languages keep zero columns."""
    langs = list(x_dict.keys())
    B = x_dict[langs[0]].shape[0]
    classes = len(lang2vocab)
    block_budget, vmem_limit = _vmem_budget()
    if block_budget_bytes is not None:
        block_budget = int(block_budget_bytes)

    cols, idxs = [], []
    for lang in langs:
        cols.append(_lang_confidence(x_dict[lang], int(lang2vocab[lang]),
                                     block_budget=block_budget,
                                     vmem_limit=vmem_limit))
        idxs.append(int(lang2index[lang]))

    if sorted(idxs) == list(range(classes)):
        order = np.argsort(np.asarray(idxs))
        return jnp.concatenate([cols[int(i)] for i in order], axis=1)

    res = jnp.zeros((B, classes), jnp.float32)
    for i, col in zip(idxs, cols):
        res = res.at[:, i].set(col[:, 0])
    return res


def lang_discriminator_forward(x_dict, lang2vocab, lang2index, params,
                               *, block_budget_bytes=None):
    res_tensor = lang_confidences(x_dict, lang2vocab, lang2index,
                                  block_budget_bytes=block_budget_bytes)
    # MLP head ((B,2)@(2,H), (B,H)@(H,2)) is far below one MXU tile -> plain jnp.
    # stop_gradient mirrors torch .detach() (forward value identical).
    res_det = jax.lax.stop_gradient(res_tensor)
    h = jnp.maximum(res_det @ params["w1"] + params["b1"], 0.0)
    linear_discriminate = h @ params["w2"] + params["b2"]
    return res_tensor, linear_discriminate


# ----------------------------------------------------------------------------
# Pure-JAX reference (correctness check)
# ----------------------------------------------------------------------------
def _reference(x_dict, lang2vocab, lang2index, params):
    first = x_dict[next(iter(x_dict))]
    B = first.shape[0]
    classes = len(lang2vocab)
    res = jnp.zeros((B, classes), dtype=jnp.float32)
    for lang, logits in x_dict.items():
        lp = jax.nn.log_softmax(logits.astype(jnp.float32), axis=-1)
        max_value = jnp.max(lp, axis=-1)
        argmax = jnp.argmax(lp, axis=-1)
        mask = argmax != lang2vocab[lang]
        length = jnp.sum(mask, axis=-1).astype(jnp.float32)
        ssum = jnp.sum(jnp.where(mask, max_value, 0.0), axis=-1)
        avg = ssum / (length * np.log(lang2vocab[lang]) + 1e-5)
        res = res.at[:, lang2index[lang]].set(avg)
    h = jnp.maximum(res @ params["w1"] + params["b1"], 0.0)
    y = h @ params["w2"] + params["b2"]
    return res, y


if __name__ == "__main__":
    # TODO(synk): torchmetrics.Accuracy / CrossEntropyLoss are training-time
    # metrics, not part of the forward pass, and are not implemented.
    lang2vocab = {"en": 26, "zh": 40}          # blank index == vocab size
    lang2index = {"en": 0, "zh": 1}
    classes = len(lang2vocab)
    hidden_dim = 32

    key = jax.random.PRNGKey(0)
    keys = jax.random.split(key, 8)

    params = {
        "w1": jax.random.normal(keys[2], (classes, hidden_dim), jnp.float32) / np.sqrt(classes),
        "b1": jax.random.normal(keys[3], (1, hidden_dim), jnp.float32) * 0.01,
        "w2": jax.random.normal(keys[4], (hidden_dim, classes), jnp.float32) / np.sqrt(hidden_dim),
        "b2": jax.random.normal(keys[5], (1, classes), jnp.float32) * 0.01,
    }

    # ---- test 1: small shapes, single-block fast path ----------------------
    B, T = 2, 8
    x_dict = {
        "en": jax.random.normal(keys[0], (B, T, lang2vocab["en"] + 1), jnp.float32),
        "zh": jax.random.normal(keys[1], (B, T, lang2vocab["zh"] + 1), jnp.float32),
    }
    # Edge case: row 0 of "en" always argmaxes the blank id (26) -> mask all
    # False -> confidence exactly 0 for that entry (0 / 1e-5).
    x_dict["en"] = x_dict["en"].at[0, :, lang2vocab["en"]].set(100.0)

    res_tensor, linear_discriminate = lang_discriminator_forward(
        x_dict, lang2vocab, lang2index, params)
    jax.block_until_ready((res_tensor, linear_discriminate))

    res_ref, lin_ref = _reference(x_dict, lang2vocab, lang2index, params)
    assert res_tensor.shape == (B, classes) and linear_discriminate.shape == (B, classes)
    assert np.allclose(np.asarray(res_tensor), np.asarray(res_ref), atol=1e-4, rtol=1e-4)
    assert np.allclose(np.asarray(linear_discriminate), np.asarray(lin_ref), atol=1e-4, rtol=1e-4)

    # ---- test 2: longer, non-multiple-of-8 T with a forced small block
    # budget to exercise the tiled / masked streaming-accumulation path ------
    B2, T2 = 4, 300
    x_dict2 = {
        "en": jax.random.normal(keys[6], (B2, T2, lang2vocab["en"] + 1), jnp.float32),
        "zh": jax.random.normal(keys[7], (B2, T2, lang2vocab["zh"] + 1), jnp.float32),
    }
    res2, lin2 = lang_discriminator_forward(x_dict2, lang2vocab, lang2index, params,
                                            block_budget_bytes=256 * 1024)
    jax.block_until_ready((res2, lin2))
    res2_ref, lin2_ref = _reference(x_dict2, lang2vocab, lang2index, params)
    assert np.allclose(np.asarray(res2), np.asarray(res2_ref), atol=2e-4, rtol=2e-4)
    assert np.allclose(np.asarray(lin2), np.asarray(lin2_ref), atol=2e-4, rtol=2e-4)

    print("KERNEL_OK")
</pallas_src>

<mosaic_0001>
module attributes {stable_mosaic.version = 11 : i64} {
  func.func @_confidence_kernel(%arg0: i32, %arg1: i32, %arg2: memref<2x8x27xf32, #tpu.memory_space<vmem>>, %arg3: memref<2x1xf32, #tpu.memory_space<vmem>>, %arg4: memref<2x1xf32, #tpu.memory_space<vmem>>, %arg5: memref<2x1xf32, #tpu.memory_space<vmem>>) attributes {dimension_semantics = [#tpu.dimension_semantics<parallel>, #tpu.dimension_semantics<arbitrary>], iteration_bounds = array<i64: 1, 1>, scalar_prefetch = 0 : i64, scratch_operands = 2 : i64, tpu.core_type = #tpu.core_type<tc>, window_params = [{transform_indices = @transform_0, window_bounds = array<i64: 2, 8, 27>}, {transform_indices = @transform_1, window_bounds = array<i64: 2, 1>}]} {
    %c0_i32 = arith.constant 0 : i32
    %0 = arith.cmpi eq, %arg1, %c0_i32 : i32
    %1 = arith.extui %0 : i1 to i32
    %c0_i32_0 = arith.constant 0 : i32
    %2 = arith.cmpi ne, %1, %c0_i32_0 : i32
    scf.if %2 {
      %cst_21 = arith.constant 0.000000e+00 : f32
      %41 = vector.broadcast %cst_21 : f32 to vector<2x1xf32>
      %c0_22 = arith.constant 0 : index
      %c0_23 = arith.constant 0 : index
      %42 = vector.load %arg4[%c0_22, %c0_23] : memref<2x1xf32, #tpu.memory_space<vmem>>, vector<2x1xf32>
      tpu.vector_store %arg4[%c0_22, %c0_23], %41 {strides = array<i32>} : memref<2x1xf32, #tpu.memory_space<vmem>>, vector<2x1xf32>,
      %cst_24 = arith.constant 0.000000e+00 : f32
      %43 = vector.broadcast %cst_24 : f32 to vector<2x1xf32>
      %c0_25 = arith.constant 0 : index
      %c0_26 = arith.constant 0 : index
      %44 = vector.load %arg5[%c0_25, %c0_26] : memref<2x1xf32, #tpu.memory_space<vmem>>, vector<2x1xf32>
      tpu.vector_store %arg5[%c0_25, %c0_26], %43 {strides = array<i32>} : memref<2x1xf32, #tpu.memory_space<vmem>>, vector<2x1xf32>,
    } else {
    }
    %c0 = arith.constant 0 : index
    %c0_1 = arith.constant 0 : index
    %c0_2 = arith.constant 0 : index
    %3 = vector.load %arg2[%c0, %c0_1, %c0_2] : memref<2x8x27xf32, #tpu.memory_space<vmem>>, vector<2x8x27xf32>
    %cst = arith.constant dense<0xFF800000> : vector<2x8xf32>
    %4 = vector.multi_reduction <maximumf>, %3, %cst [2] : vector<2x8x27xf32> to vector<2x8xf32>
    %5 = vector.shape_cast %4 : vector<2x8xf32> to vector<2x8x1xf32>
    %6 = vector.broadcast %5 : vector<2x8x1xf32> to vector<2x8x27xf32>
    %7 = arith.subf %3, %6 : vector<2x8x27xf32>
    %8 = math.exp %7 : vector<2x8x27xf32>
    %cst_3 = arith.constant dense<0.000000e+00> : vector<2x8xf32>
    %9 = vector.multi_reduction <add>, %8, %cst_3 [2] : vector<2x8x27xf32> to vector<2x8xf32>
    %10 = vector.shape_cast %9 : vector<2x8xf32> to vector<2x8x1xf32>
    %11 = math.log %10 : vector<2x8x1xf32>
    %cst_4 = arith.constant 0.000000e+00 : f32
    %12 = vector.broadcast %cst_4 : f32 to vector<2x8x1xf32>
    %13 = arith.subf %12, %11 : vector<2x8x1xf32>
    %14 = tpu.iota {dimensions = array<i32: 2>} : vector<1x1x27xi32>
    %15 = arith.sitofp %14 : vector<1x1x27xi32> to vector<1x1x27xf32>
    %16 = vector.broadcast %5 : vector<2x8x1xf32> to vector<2x8x27xf32>
    %17 = arith.cmpf oeq, %3, %16 : vector<2x8x27xf32>
    %cst_5 = arith.constant 2.700000e+01 : f32
    %18 = vector.shape_cast %15 : vector<1x1x27xf32> to vector<1x1x27xf32>
    %19 = vector.broadcast %18 : vector<1x1x27xf32> to vector<2x8x27xf32>
    %20 = vector.broadcast %cst_5 : f32 to vector<2x8x27xf32>
    %21 = arith.select %17, %19, %20 : vector<2x8x27xi1>, vector<2x8x27xf32>
    %cst_6 = arith.constant dense<0x7F800000> : vector<2x8xf32>
    %22 = vector.multi_reduction <minimumf>, %21, %cst_6 [2] : vector<2x8x27xf32> to vector<2x8xf32>
    %23 = vector.shape_cast %22 : vector<2x8xf32> to vector<2x8x1xf32>
    %cst_7 = arith.constant 2.600000e+01 : f32
    %24 = vector.broadcast %cst_7 : f32 to vector<2x8x1xf32>
    %25 = arith.cmpf one, %23, %24 : vector<2x8x1xf32>
    %c0_8 = arith.constant 0 : index
    %c0_9 = arith.constant 0 : index
    %26 = vector.load %arg5[%c0_8, %c0_9] : memref<2x1xf32, #tpu.memory_space<vmem>>, vector<2x1xf32>
    %27 = arith.extui %25 : vector<2x8x1xi1> to vector<2x8x1xi32>
    %28 = arith.sitofp %27 : vector<2x8x1xi32> to vector<2x8x1xf32>
    %cst_10 = arith.constant dense<0.000000e+00> : vector<2x1xf32>
    %29 = vector.multi_reduction <add>, %28, %cst_10 [1] : vector<2x8x1xf32> to vector<2x1xf32>
    %30 = arith.addf %26, %29 : vector<2x1xf32>
    %c0_11 = arith.constant 0 : index
    %c0_12 = arith.constant 0 : index
    %31 = vector.load %arg5[%c0_11, %c0_12] : memref<2x1xf32, #tpu.memory_space<vmem>>, vector<2x1xf32>
    tpu.vector_store %arg5[%c0_11, %c0_12], %30 {strides = array<i32>} : memref<2x1xf32, #tpu.memory_space<vmem>>, vector<2x1xf32>,
    %c0_13 = arith.constant 0 : index
    %c0_14 = arith.constant 0 : index
    %32 = vector.load %arg4[%c0_13, %c0_14] : memref<2x1xf32, #tpu.memory_space<vmem>>, vector<2x1xf32>
    %cst_15 = arith.constant 0.000000e+00 : f32
    %33 = vector.broadcast %cst_15 : f32 to vector<2x8x1xf32>
    %34 = arith.select %25, %13, %33 : vector<2x8x1xi1>, vector<2x8x1xf32>
    %cst_16 = arith.constant dense<0.000000e+00> : vector<2x1xf32>
    %35 = vector.multi_reduction <add>, %34, %cst_16 [1] : vector<2x8x1xf32> to vector<2x1xf32>
    %36 = arith.addf %32, %35 : vector<2x1xf32>
    %c0_17 = arith.constant 0 : index
    %c0_18 = arith.constant 0 : index
    %37 = vector.load %arg4[%c0_17, %c0_18] : memref<2x1xf32, #tpu.memory_space<vmem>>, vector<2x1xf32>
    tpu.vector_store %arg4[%c0_17, %c0_18], %36 {strides = array<i32>} : memref<2x1xf32, #tpu.memory_space<vmem>>, vector<2x1xf32>,
    %c0_i32_19 = arith.constant 0 : i32
    %38 = arith.cmpi eq, %arg1, %c0_i32_19 : i32
    %39 = arith.extui %38 : i1 to i32
    %c0_i32_20 = arith.constant 0 : i32
    %40 = arith.cmpi ne, %39, %c0_i32_20 : i32
    scf.if %40 {
      %c0_21 = arith.constant 0 : index
      %c0_22 = arith.constant 0 : index
      %41 = vector.load %arg4[%c0_21, %c0_22] : memref<2x1xf32, #tpu.memory_space<vmem>>, vector<2x1xf32>
      %c0_23 = arith.constant 0 : index
      %c0_24 = arith.constant 0 : index
      %42 = vector.load %arg5[%c0_23, %c0_24] : memref<2x1xf32, #tpu.memory_space<vmem>>, vector<2x1xf32>
      %cst_25 = arith.constant 3.25809646 : f32
      %43 = vector.broadcast %cst_25 : f32 to vector<2x1xf32>
      %44 = arith.mulf %42, %43 : vector<2x1xf32>
      %cst_26 = arith.constant 9.99999974E-6 : f32
      %45 = vector.broadcast %cst_26 : f32 to vector<2x1xf32>
      %46 = arith.addf %44, %45 : vector<2x1xf32>
      %47 = arith.divf %41, %46 : vector<2x1xf32>
      %c0_27 = arith.constant 0 : index
      %c0_28 = arith.constant 0 : index
      %48 = vector.load %arg3[%c0_27, %c0_28] : memref<2x1xf32, #tpu.memory_space<vmem>>, vector<2x1xf32>
      tpu.vector_store %arg3[%c0_27, %c0_28], %47 {strides = array<i32>} : memref<2x1xf32, #tpu.memory_space<vmem>>, vector<2x1xf32>,
    } else {
    }
    return
  }
  func.func @transform_0(%arg0: i32, %arg1: i32) -> (i32, i32, i32) {
    %c0_i32 = arith.constant 0 : i32
    %c0_i32_0 = arith.constant 0 : i32
    return %arg0, %arg1, %c0_i32 : i32, i32, i32
  }
  func.func @transform_1(%arg0: i32, %arg1: i32) -> (i32, i32) {
    %c0_i32 = arith.constant 0 : i32
    %c0_i32_0 = arith.constant 0 : i32
    return %arg0, %c0_i32 : i32, i32
  }
}

</mosaic_0001>

<bundles_post_ra>
// kernel: tpu_custom_call.1
= control target key start
LH: loop header
LB: loop body
LE: loop exit
PB: predicated region body
PF: predicated region fallthrough
CT: control target
= control target key end

     0   :  { %6 = vsyncpa [#allocation5], 0  ;;  %s189_s9 = smov [#allocation4]   ;;  %s190_s11 = smov 128   ;;  %s226_s0 = inlined_call_operand.hbm [shape: f32[2,8,27], index: 0, kind: input, shape index: {}]   ;;  %s227_s1 = inlined_call_operand.vmem [shape: f32[2,1], index: 1, kind: output, shape index: {}]  }
   0x1   :  { %s11_s8 = sshll.u32 %s226_s0, 4  ;;  %s13_s10 = sshll.u32 %s189_s9, 4  ;;  %s12_s8 = int_to_ptr.hbm [resolvable:$true] %s11_s8  ;;  %s14_s10 = int_to_ptr.vmem [resolvable:$true] %s13_s10 }
   0x2   :  { %s191_s12 = smov 8  }
   0x3   :  { %19 = dma.hbm_to_vmem [thread:$0]  %s12_s8, 256, %s14_s10, [#allocation5], %s190_s11, %s190_s11, %s191_s12  }
   0x4   :  { %187 = dma.done.wait [#allocation5], 256  }
   0x5   :  { %188 = vsyncadd [#allocation5], 4294967040  ;;  %vm33_vm0 = vcmask 220160   ;;  %v31_v0 = vld [vmem:[#allocation4] sm:$0xff]  ;;  %v32_v2 = vld [vmem:[#allocation4 + $0x8] sm:$0xff]  ;;  %vm28_vm1 = vcmask 1024   ;;  %v58_v4 = vlaneseq }
   0x6   :  { %v34_v1 = vsel %vm33_vm0, %v31_v0, -inf  ;;  %v37_v3 = vsel %vm33_vm0, %v32_v2, -inf  ;;  %v192_v5 = vmov 0.0   ;;  %vm92_vm6 = vcmask 1041409  }
   0x7   :  { %35 = vmax.xlane.f32.xlu0 %v34_v1  ;;  %29 = vst.msk [vmem:[#allocation2] sm:$0x3] %vm28_vm1, %v192_v5  ;;  %v59_v6 = vand.u32 127, %v58_v4 }
   0x8   :  { %30 = vst.msk [vmem:[#allocation3] sm:$0x3] %vm28_vm1, %v192_v5 }
   0x9   :  { %v60_v7 = vcvt.s32.f32 %v59_v6 }
   0xe   :  { %v98_v1 = vld [vmem:[#allocation2] sm:$0x3] }
   0xf   :  { %38 = vmax.xlane.f32.xlu0 %v37_v3  ;;  %v73_v42 = vld [vmem:[#allocation3] sm:$0x3] }
  0x7a   :  { %v36_v8 = vpop.xlane.xlu0 %35 }
  0x7b   :  { %v40_v9 = vsub.f32 %v31_v0, %v36_v8  ;;  %vm61_vm2 = vcmp.eq.f32.partialorder %v31_v0, %v36_v8 }
  0x7c   :  { %v63_v10 = vsel %vm61_vm2, %v60_v7, 27.0 }
  0x7d   :  { %v42_v11 = vmul.f32 1.442695, %v40_v9  ;;  %v65_v12 = vsel %vm33_vm0, %v63_v10, inf }
  0x7e   :  { %66 = vmin.xlane.f32.xlu1 %v65_v12 }
  0x7f   :  { %153 = vpow2.f32 %v42_v11 }
  0x82   :  { %v39_v13 = vpop.xlane.xlu0 %38 }
  0x83   :  { %v41_v14 = vsub.f32 %v32_v2, %v39_v13  ;;  %vm62_vm3 = vcmp.eq.f32.partialorder %v32_v2, %v39_v13 }
  0x84   :  { %v64_v15 = vsel %vm62_vm3, %v60_v7, 27.0 }
  0x85   :  { %v154_v16 = vpop.eup %153  ;;  %v44_v17 = vmul.f32 1.442695, %v41_v14  ;;  %v68_v18 = vsel %vm33_vm0, %v64_v15, inf }
  0x86   :  { %69 = vmin.xlane.f32.xlu1 %v68_v18  ;;  %v46_v19 = vsel %vm33_vm0, %v154_v16, 0.0 }
  0x87   :  { %155 = vpow2.f32 %v44_v17  ;;  %47 = vadd.xlane.f32.xlu2 %v46_v19 }
  0x8d   :  { %v156_v20 = vpop.eup %155 }
  0x8e   :  { %v49_v21 = vsel %vm33_vm0, %v156_v20, 0.0 }
  0x8f   :  { %50 = vadd.xlane.f32.xlu2 %v49_v21 }
  0xf1   :  { %v67_v22 = vpop.xlane.xlu1 %66 }
  0xf2   :  { %vm71_vm4 = vcmp.ne.f32.partialorder %v67_v22, 26.0 }
  0xf3   :  { %v147_v23 = vsel %vm71_vm4, 1.0, %v192_v5 }
  0xf4   :  { %v78_v24 = vrot.slane %v147_v23, 4 }
  0xf6   :  { %v79_v25 = vadd.f32 %v147_v23, %v78_v24 }
  0xf8   :  { %v80_v27 = vrot.slane %v79_v25, 2 }
  0xf9   :  { %v70_v26 = vpop.xlane.xlu1 %69 }
  0xfa   :  { %vm72_vm5 = vcmp.ne.f32.partialorder %v70_v26, 26.0  ;;  %v48_v28 = vpop.xlane.xlu2 %47  ;;  %v81_v31 = vadd.f32 %v80_v27, %v79_v25 }
  0xfb   :  { %v148_v29 = vsel %vm72_vm5, 1.0, %v192_v5  ;;  %157 = vlog2.f32 %v48_v28 }
  0xfc   :  { %v84_v30 = vrot.slane %v148_v29, 4  ;;  %v82_v35 = vrot.slane %v81_v31, 1 }
  0xfe   :  { %v85_v32 = vadd.f32 %v148_v29, %v84_v30  ;;  %v83_v41 = vadd.f32 %v82_v35, %v81_v31 }
 0x100   :  { %v86_v33 = vrot.slane %v85_v32, 2 }
 0x101   :  { %v158_v34 = vpop.eup %157 }
 0x102   :  { %v87_v36 = vadd.f32 %v86_v33, %v85_v32  ;;  %v53_v37 = vmul.f32 0.6931472, %v158_v34  ;;  %v51_v38 = vpop.xlane.xlu2 %50 }
 0x103   :  { %159 = vlog2.f32 %v51_v38 }
 0x104   :  { %v88_v39 = vrot.slane %v87_v36, 1  ;;  %v56_v40 = vsub.f32 0.0, %v53_v37 }
 0x106   :  { %v89_v43 = vadd.f32 %v88_v39, %v87_v36  ;;  %v99_v44 = vsel %vm71_vm4, %v56_v40, 0.0 }
 0x107   :  { %v101_v45 = vrot.slane %v99_v44, 4 }
 0x108   :  { %v93_v46 = vsel %vm92_vm6, %v89_v43, %v83_v41 }
 0x109   :  { %v160_v47 = vpop.eup %159  ;;  %v95_v48 = vadd.f32 %v93_v46, %v73_v42  ;;  %v102_v49 = vadd.f32 %v101_v45, %v99_v44 }
 0x10a   :  { %v55_v50 = vmul.f32 0.6931472, %v160_v47 }
 0x10b   :  { %97 = vst.msk [vmem:[#allocation3] sm:$0x3] %vm28_vm1, %v95_v48  ;;  %v103_v52 = vrot.slane %v102_v49, 2 }
 0x10c   :  { %v57_v51 = vsub.f32 0.0, %v55_v50 }
 0x10d   :  { %v104_v55 = vadd.f32 %v103_v52, %v102_v49 }
 0x10e   :  { %v100_v53 = vsel %vm72_vm5, %v57_v51, 0.0 }
 0x10f   :  { %v107_v54 = vrot.slane %v100_v53, 4  ;;  %v105_v61 = vrot.slane %v104_v55, 1 }
 0x111   :  { %v108_v56 = vadd.f32 %v107_v54, %v100_v53  ;;  %v106_v0 = vadd.f32 %v105_v61, %v104_v55 }
 0x112   :  { %v123_v57 = vld [vmem:[#allocation3] sm:$0x3] }
 0x113   :  { %v124_v58 = vmul.f32 3.2580965, %v123_v57  ;;  %v109_v59 = vrot.slane %v108_v56, 2 }
 0x115   :  { %v125_v60 = vadd.f32 1e-05, %v124_v58  ;;  %v110_v62 = vadd.f32 %v109_v59, %v108_v56 }
 0x117   :  { %161 = vrcp.f32 %v125_v60  ;;  %v111_v63 = vrot.slane %v110_v62, 1  ;;  %v137_v8 = vand.u32 2147483648, %v125_v60  ;;  %v135_v10 = vand.u32 2147483647, %v125_v60 }
 0x118   :  { %vm131_vm8 = vweird.f32 %v125_v60 }
 0x119   :  { %v112_v2 = vadd.f32 %v111_v63, %v110_v62  ;;  %v138_v12 = vor.u32 1.1754944e-38, %v137_v8  ;;  %vm136_vm10 = vcmp.eq.f32.partialorder %v135_v10, 8.507059e+37 }
 0x11b   :  { %v115_v3 = vsel %vm92_vm6, %v112_v2, %v106_v0 }
 0x11c   :  { %v117_v4 = vadd.f32 %v115_v3, %v98_v1 }
 0x11d   :  { %v162_v5 = vpop.eup %161 }
 0x11e   :  { %v127_v6 = vmul.f32 %v162_v5, %v125_v60  ;;  %118 = vst.msk [vmem:[#allocation2] sm:$0x3] %vm28_vm1, %v117_v4  ;;  %vm132_vm7 = vweird.f32 %v162_v5 }
 0x11f   :  { %vm133_vm9 = vmor %vm131_vm8, %vm132_vm7 }
 0x120   :  { %v128_v7 = vsub.f32 1.0, %v127_v6 }
 0x122   :  { %v129_v9 = vmul.f32 %v162_v5, %v128_v7 }
 0x124   :  { %v130_v11 = vadd.f32 %v162_v5, %v129_v9 }
 0x125   :  { %v122_v14 = vld [vmem:[#allocation2] sm:$0x3] }
 0x126   :  { %v134_v13 = vsel %vm133_vm9, %v162_v5, %v130_v11 }
 0x127   :  { %v139_v15 = vsel %vm136_vm10, %v138_v12, %v134_v13 }
 0x128   :  { %v140_v16 = vmul.f32 %v139_v15, %v122_v14 }
 0x12a   :  { %141 = vst.msk [vmem:[%s227_s1] sm:$0x3] %vm28_vm1, %v140_v16 }
 0x12b   :  { %146 = vsyncpa [#allocation5], 1 }

</bundles_post_ra>
